<compile_context>
chip_gen: v7x
topology: tpu7x:2x2x1
jax: 0.10.0
libtpu: 0.0.40
codegen_flags: <defaults>
</compile_context>

<pallas_src>
import jax
import jax.numpy as jnp
from jax.experimental import pallas as pl
from jax.experimental.pallas import tpu as pltpu


def mlp_diffusion_kernel(xt_ref, table_ref, w1_ref, w2_ref, w3_ref, b3_ref, o_ref):
    tb = xt_ref.shape[0]
    K = table_ref.shape[0]        # n_steps + 2
    n_steps = K - 2
    U = w1_ref.shape[0]
    cdt = w1_ref.dtype            # MXU operand dtype (bf16 or f32); accumulation is f32

    xt = xt_ref[...]              # (tb, 4) f32: [x0, x1, t, 0]
    x0 = xt[:, 0:1]
    x1 = xt[:, 1:2]
    t_col = xt[:, 2:3].astype(jnp.int32)

    # Build lhs = [one_hot(t) | x0 | x1] in-register (one lane-tile wide).
    ids = jax.lax.broadcasted_iota(jnp.int32, (tb, K), 1)
    lhs = (ids == t_col).astype(jnp.float32)
    lhs = jnp.where(ids == n_steps, x0, lhs)
    lhs = jnp.where(ids == n_steps + 1, x1, lhs)
    lhs = lhs.astype(cdt)

    # One fused MXU pass: [x@W0 + e0[t]+b0 | e1[t]+b1 | e2[t]+b2]  (f32 accumulate)
    emb = jnp.dot(lhs, table_ref[...], preferred_element_type=jnp.float32)

    # block 0: ReLU of the fused pre-activation, cast to compute dtype
    h = jnp.maximum(emb[:, 0:U], 0.0).astype(cdt)

    # block 1: Linear(U, U) + (e1[t] + b1) -> ReLU
    h = jnp.maximum(
        jnp.dot(h, w1_ref[...], preferred_element_type=jnp.float32) + emb[:, U:2 * U],
        0.0).astype(cdt)

    # block 2: Linear(U, U) + (e2[t] + b2) -> ReLU
    h = jnp.maximum(
        jnp.dot(h, w2_ref[...], preferred_element_type=jnp.float32) + emb[:, 2 * U:3 * U],
        0.0).astype(cdt)

    # final: Linear(U, 2)
    # TODO(synk): last-dim-2 output keeps masked vst stores; lane-dense padding would
    # blow up HBM writeback 64x, so the tiny masked store remains the better trade.
    o_ref[...] = (jnp.dot(h, w3_ref[...], preferred_element_type=jnp.float32)
                  + b3_ref[...].astype(jnp.float32)).astype(o_ref.dtype)


def _pick_tb(B):
    """Batch tile: single tile for small B, else a balanced grid of 2 (capped)."""
    if B <= 256:
        return max(8, 8 * pl.cdiv(B, 8))
    return min(256 * pl.cdiv(B, 2 * 256), 2048)


def mlp_diffusion_forward(x, t, params, *, tb=None, param_dtype=jnp.bfloat16):
    """Pallas forward. x: (B, 2) f32, t: (B,) int.

    tb: batch tile (multiple of 8); None -> auto (single tile or balanced grid of 2).
    param_dtype: storage/compute dtype for weights & the fused table (bf16 default,
                 native MXU rate on v6e/v7x); accumulation is always f32, b3 stays f32.
    """
    w0, b0, w1, b1, w2, b2, w3, b3, e0, e1, e2 = params
    B = x.shape[0]
    U = w0.shape[1]
    n_steps = e0.shape[0]
    K = n_steps + 2

    if tb is None:
        tb = _pick_tb(B)
    assert tb % 8 == 0

    f32 = jnp.float32
    # Fused table: rows 0..n_steps-1 = [e0+b0 | e1+b1 | e2+b2]; last 2 rows = [w0 | 0 | 0].
    top = jnp.concatenate([e0 + b0[None, :], e1 + b1[None, :], e2 + b2[None, :]], axis=1)
    w0rows = jnp.concatenate([w0.astype(f32), jnp.zeros((2, 2 * U), f32)], axis=1)
    table = jnp.concatenate([top.astype(f32), w0rows], axis=0)          # (K, 3U)

    cast = lambda a: a.astype(param_dtype)
    table_c, w1c, w2c, w3c = cast(table), cast(w1), cast(w2), cast(w3)
    b3r = b3.reshape(1, 2).astype(f32)                                  # tiny; keep f32

    # Merge x and t into one (B, 4) f32 stream: [x0, x1, t, 0].
    xt = jnp.concatenate(
        [x.astype(f32), t.astype(f32).reshape(B, 1), jnp.zeros((B, 1), f32)], axis=1)

    # Pad batch to a multiple of the tile; padded rows (x=0, t=0) are sliced off after.
    grid_b = pl.cdiv(B, tb)
    Bp = grid_b * tb
    if Bp != B:
        xt = jnp.pad(xt, ((0, Bp - B), (0, 0)))

    row = lambda i: (i, 0)   # tiled over batch
    rep = lambda i: (0, 0)   # weights / fused table: same block every step -> resident

    out = pl.pallas_call(
        mlp_diffusion_kernel,
        out_shape=jax.ShapeDtypeStruct((Bp, 2), x.dtype),
        grid_spec=pltpu.PrefetchScalarGridSpec(
            num_scalar_prefetch=0,
            grid=(grid_b,),
            in_specs=[
                pl.BlockSpec((tb, 4), row),       # [x0, x1, t, 0]
                pl.BlockSpec((K, 3 * U), rep),    # fused table (resident, ~27 KiB bf16)
                pl.BlockSpec((U, U), rep),        # w1
                pl.BlockSpec((U, U), rep),        # w2
                pl.BlockSpec((U, 2), rep),        # w3
                pl.BlockSpec((1, 2), rep),        # b3
            ],
            out_specs=pl.BlockSpec((tb, 2), row),
        ),
        compiler_params=pltpu.CompilerParams(
            dimension_semantics=("parallel",)),   # grid of 2 -> both v7x TCs used
    )(xt, table_c, w1c, w2c, w3c, b3r)
    return out[:B]


def init_params(key, n_steps, num_units):
    """Deterministic synthetic parameters (shapes match the PyTorch module)."""
    ks = jax.random.split(key, 11)
    U = num_units

    def lin(kw, kb, fan_in, fan_out):
        bound = 1.0 / jnp.sqrt(fan_in)
        w = jax.random.uniform(kw, (fan_in, fan_out), jnp.float32, -bound, bound)
        b = jax.random.uniform(kb, (fan_out,), jnp.float32, -bound, bound)
        return w, b

    w0, b0 = lin(ks[0], ks[1], 2, U)
    w1, b1 = lin(ks[2], ks[3], U, U)
    w2, b2 = lin(ks[4], ks[5], U, U)
    w3, b3 = lin(ks[6], ks[7], U, 2)
    e0 = jax.random.normal(ks[8], (n_steps, U), jnp.float32)
    e1 = jax.random.normal(ks[9], (n_steps, U), jnp.float32)
    e2 = jax.random.normal(ks[10], (n_steps, U), jnp.float32)
    return (w0, b0, w1, b1, w2, b2, w3, b3, e0, e1, e2)


def mlp_diffusion_reference(x, t, params):
    """Plain-JAX reference mirroring the PyTorch forward."""
    w0, b0, w1, b1, w2, b2, w3, b3, e0, e1, e2 = params
    h = x
    for (w, b, e) in ((w0, b0, e0), (w1, b1, e1), (w2, b2, e2)):
        h = h @ w + b
        h = h + e[t]
        h = jnp.maximum(h, 0.0)
    return h @ w3 + b3


if __name__ == "__main__":
    key = jax.random.PRNGKey(0)
    k_p, k_x, k_t = jax.random.split(key, 3)

    n_steps = 16
    num_units = 128   # module default

    params = init_params(k_p, n_steps, num_units)

    for batch in (37, 1000):   # grid=1 (tiny tile) and grid=2 (balanced, padded) paths
        kx, kt = jax.random.split(jax.random.fold_in(k_x, batch))
        x = jax.random.normal(kx, (batch, 2), jnp.float32)
        t = jax.random.randint(kt, (batch,), 0, n_steps, jnp.int32)
        ref = mlp_diffusion_reference(x, t, params)

        # f32 parameters: strict check vs the plain-JAX reference.
        out = jax.block_until_ready(
            mlp_diffusion_forward(x, t, params, param_dtype=jnp.float32))
        assert out.shape == (batch, 2)
        assert jnp.allclose(out, ref, atol=2e-4, rtol=2e-4), "f32 mismatch vs reference"

        # default bf16 parameter storage (native MXU rate); f32 accumulation, looser tol.
        out_bf16 = jax.block_until_ready(mlp_diffusion_forward(x, t, params))
        assert out_bf16.shape == (batch, 2)
        assert jnp.allclose(out_bf16, ref, atol=5e-2, rtol=5e-2), "bf16 mismatch vs reference"

    print("KERNEL_OK")
</pallas_src>

<mosaic_0001>
module attributes {stable_mosaic.version = 11 : i64} {
  func.func @mlp_diffusion_kernel(%arg0: i32, %arg1: memref<40x4xf32, #tpu.memory_space<vmem>>, %arg2: memref<18x384xf32, #tpu.memory_space<vmem>>, %arg3: memref<128x128xf32, #tpu.memory_space<vmem>>, %arg4: memref<128x128xf32, #tpu.memory_space<vmem>>, %arg5: memref<128x2xf32, #tpu.memory_space<vmem>>, %arg6: memref<1x2xf32, #tpu.memory_space<vmem>>, %arg7: memref<40x2xf32, #tpu.memory_space<vmem>>) attributes {dimension_semantics = [#tpu.dimension_semantics<parallel>], iteration_bounds = array<i64: 1>, scalar_prefetch = 0 : i64, scratch_operands = 0 : i64, tpu.core_type = #tpu.core_type<tc>, window_params = [{transform_indices = @transform_0, window_bounds = array<i64: 40, 4>}, {pipeline_mode = #tpu.pipeline_mode<synchronous>, transform_indices = @transform_1, window_bounds = array<i64: 18, 384>}, {pipeline_mode = #tpu.pipeline_mode<synchronous>, transform_indices = @transform_2, window_bounds = array<i64: 128, 128>}, {pipeline_mode = #tpu.pipeline_mode<synchronous>, transform_indices = @transform_3, window_bounds = array<i64: 128, 128>}, {pipeline_mode = #tpu.pipeline_mode<synchronous>, transform_indices = @transform_4, window_bounds = array<i64: 128, 2>}, {pipeline_mode = #tpu.pipeline_mode<synchronous>, transform_indices = @transform_5, window_bounds = array<i64: 1, 2>}, {transform_indices = @transform_6, window_bounds = array<i64: 40, 2>}]} {
    %c0 = arith.constant 0 : index
    %c0_0 = arith.constant 0 : index
    %0 = vector.load %arg1[%c0, %c0_0] : memref<40x4xf32, #tpu.memory_space<vmem>>, vector<40x4xf32>
    %1 = vector.extract_strided_slice %0 {offsets = [0, 0], sizes = [40, 1], strides = [1, 1]} : vector<40x4xf32> to vector<40x1xf32>
    %2 = vector.extract_strided_slice %0 {offsets = [0, 1], sizes = [40, 1], strides = [1, 1]} : vector<40x4xf32> to vector<40x1xf32>
    %3 = vector.extract_strided_slice %0 {offsets = [0, 2], sizes = [40, 1], strides = [1, 1]} : vector<40x4xf32> to vector<40x1xf32>
    %4 = arith.fptosi %3 : vector<40x1xf32> to vector<40x1xi32>
    %5 = tpu.iota {dimensions = array<i32: 1>} : vector<40x18xi32>
    %6 = vector.broadcast %4 : vector<40x1xi32> to vector<40x18xi32>
    %7 = arith.cmpi eq, %5, %6 : vector<40x18xi32>
    %8 = arith.extui %7 : vector<40x18xi1> to vector<40x18xi32>
    %9 = arith.sitofp %8 : vector<40x18xi32> to vector<40x18xf32>
    %c16_i32 = arith.constant 16 : i32
    %10 = vector.broadcast %c16_i32 : i32 to vector<40x18xi32>
    %11 = arith.cmpi eq, %5, %10 : vector<40x18xi32>
    %12 = vector.shape_cast %1 : vector<40x1xf32> to vector<40x1xf32>
    %13 = vector.broadcast %12 : vector<40x1xf32> to vector<40x18xf32>
    %14 = arith.select %11, %13, %9 : vector<40x18xi1>, vector<40x18xf32>
    %c17_i32 = arith.constant 17 : i32
    %15 = vector.broadcast %c17_i32 : i32 to vector<40x18xi32>
    %16 = arith.cmpi eq, %5, %15 : vector<40x18xi32>
    %17 = vector.shape_cast %2 : vector<40x1xf32> to vector<40x1xf32>
    %18 = vector.broadcast %17 : vector<40x1xf32> to vector<40x18xf32>
    %19 = arith.select %16, %18, %14 : vector<40x18xi1>, vector<40x18xf32>
    %c0_1 = arith.constant 0 : index
    %c0_2 = arith.constant 0 : index
    %20 = vector.load %arg2[%c0_1, %c0_2] : memref<18x384xf32, #tpu.memory_space<vmem>>, vector<18x384xf32>
    %cst = arith.constant dense<0.000000e+00> : vector<40x384xf32>
    %21 = tpu.matmul %19, %20, %cst {dimension_numbers = #tpu.dot_dimension_numbers<[1], [0], [0], [1], [0, 0, 1, 1], [], []>} : vector<40x18xf32>, vector<18x384xf32>, vector<40x384xf32> -> vector<40x384xf32>
    %22 = vector.extract_strided_slice %21 {offsets = [0, 0], sizes = [40, 128], strides = [1, 1]} : vector<40x384xf32> to vector<40x128xf32>
    %cst_3 = arith.constant 0.000000e+00 : f32
    %23 = vector.broadcast %cst_3 : f32 to vector<40x128xf32>
    %24 = arith.maximumf %22, %23 : vector<40x128xf32>
    %c0_4 = arith.constant 0 : index
    %c0_5 = arith.constant 0 : index
    %25 = vector.load %arg3[%c0_4, %c0_5] : memref<128x128xf32, #tpu.memory_space<vmem>>, vector<128x128xf32>
    %cst_6 = arith.constant dense<0.000000e+00> : vector<40x128xf32>
    %26 = tpu.matmul %24, %25, %cst_6 {dimension_numbers = #tpu.dot_dimension_numbers<[1], [0], [0], [1], [0, 0, 1, 1], [], []>} : vector<40x128xf32>, vector<128x128xf32>, vector<40x128xf32> -> vector<40x128xf32>
    %27 = vector.extract_strided_slice %21 {offsets = [0, 128], sizes = [40, 128], strides = [1, 1]} : vector<40x384xf32> to vector<40x128xf32>
    %28 = arith.addf %26, %27 : vector<40x128xf32>
    %cst_7 = arith.constant 0.000000e+00 : f32
    %29 = vector.broadcast %cst_7 : f32 to vector<40x128xf32>
    %30 = arith.maximumf %28, %29 : vector<40x128xf32>
    %c0_8 = arith.constant 0 : index
    %c0_9 = arith.constant 0 : index
    %31 = vector.load %arg4[%c0_8, %c0_9] : memref<128x128xf32, #tpu.memory_space<vmem>>, vector<128x128xf32>
    %cst_10 = arith.constant dense<0.000000e+00> : vector<40x128xf32>
    %32 = tpu.matmul %30, %31, %cst_10 {dimension_numbers = #tpu.dot_dimension_numbers<[1], [0], [0], [1], [0, 0, 1, 1], [], []>} : vector<40x128xf32>, vector<128x128xf32>, vector<40x128xf32> -> vector<40x128xf32>
    %33 = vector.extract_strided_slice %21 {offsets = [0, 256], sizes = [40, 128], strides = [1, 1]} : vector<40x384xf32> to vector<40x128xf32>
    %34 = arith.addf %32, %33 : vector<40x128xf32>
    %cst_11 = arith.constant 0.000000e+00 : f32
    %35 = vector.broadcast %cst_11 : f32 to vector<40x128xf32>
    %36 = arith.maximumf %34, %35 : vector<40x128xf32>
    %c0_12 = arith.constant 0 : index
    %c0_13 = arith.constant 0 : index
    %37 = vector.load %arg5[%c0_12, %c0_13] : memref<128x2xf32, #tpu.memory_space<vmem>>, vector<128x2xf32>
    %cst_14 = arith.constant dense<0.000000e+00> : vector<40x2xf32>
    %38 = tpu.matmul %36, %37, %cst_14 {dimension_numbers = #tpu.dot_dimension_numbers<[1], [0], [0], [1], [0, 0, 1, 1], [], []>} : vector<40x128xf32>, vector<128x2xf32>, vector<40x2xf32> -> vector<40x2xf32>
    %c0_15 = arith.constant 0 : index
    %c0_16 = arith.constant 0 : index
    %39 = vector.load %arg6[%c0_15, %c0_16] : memref<1x2xf32, #tpu.memory_space<vmem>>, vector<1x2xf32>
    %40 = vector.broadcast %39 : vector<1x2xf32> to vector<40x2xf32>
    %41 = arith.addf %38, %40 : vector<40x2xf32>
    %c0_17 = arith.constant 0 : index
    %c0_18 = arith.constant 0 : index
    %42 = vector.load %arg7[%c0_17, %c0_18] : memref<40x2xf32, #tpu.memory_space<vmem>>, vector<40x2xf32>
    tpu.vector_store %arg7[%c0_17, %c0_18], %41 {strides = array<i32>} : memref<40x2xf32, #tpu.memory_space<vmem>>, vector<40x2xf32>,
    return
  }
  func.func @transform_0(%arg0: i32) -> (i32, i32) {
    %c0_i32 = arith.constant 0 : i32
    %c0_i32_0 = arith.constant 0 : i32
    return %arg0, %c0_i32 : i32, i32
  }
  func.func @transform_1(%arg0: i32) -> (i32, i32) {
    %c0_i32 = arith.constant 0 : i32
    %c0_i32_0 = arith.constant 0 : i32
    %c0_i32_1 = arith.constant 0 : i32
    return %c0_i32, %c0_i32_0 : i32, i32
  }
  func.func @transform_2(%arg0: i32) -> (i32, i32) {
    %c0_i32 = arith.constant 0 : i32
    %c0_i32_0 = arith.constant 0 : i32
    %c0_i32_1 = arith.constant 0 : i32
    return %c0_i32, %c0_i32_0 : i32, i32
  }
  func.func @transform_3(%arg0: i32) -> (i32, i32) {
    %c0_i32 = arith.constant 0 : i32
    %c0_i32_0 = arith.constant 0 : i32
    %c0_i32_1 = arith.constant 0 : i32
    return %c0_i32, %c0_i32_0 : i32, i32
  }
  func.func @transform_4(%arg0: i32) -> (i32, i32) {
    %c0_i32 = arith.constant 0 : i32
    %c0_i32_0 = arith.constant 0 : i32
    %c0_i32_1 = arith.constant 0 : i32
    return %c0_i32, %c0_i32_0 : i32, i32
  }
  func.func @transform_5(%arg0: i32) -> (i32, i32) {
    %c0_i32 = arith.constant 0 : i32
    %c0_i32_0 = arith.constant 0 : i32
    %c0_i32_1 = arith.constant 0 : i32
    return %c0_i32, %c0_i32_0 : i32, i32
  }
  func.func @transform_6(%arg0: i32) -> (i32, i32) {
    %c0_i32 = arith.constant 0 : i32
    %c0_i32_0 = arith.constant 0 : i32
    return %arg0, %c0_i32 : i32, i32
  }
}

</mosaic_0001>

<bundles_post_ra>
// kernel: tpu_custom_call.1
= control target key start
LH: loop header
LB: loop body
LE: loop exit
PB: predicated region body
PF: predicated region fallthrough
CT: control target
= control target key end

     0   :  { %11 = vsyncpa [#allocation3], 0  ;;  %s1510_s0 = inlined_call_operand.vmem [shape: f32[40,4], index: 0, kind: input, shape index: {}]   ;;  %s1511_s1 = inlined_call_operand.hbm [shape: f32[18,384], index: 1, kind: input, shape index: {}]   ;;  %s1512_s2 = inlined_call_operand.vmem [shape: f32[128,128], index: 2, kind: input, shape index: {}]   ;;  %s1513_s3 = inlined_call_operand.hbm [shape: f32[128,128], index: 3, kind: input, shape index: {}]   ;;  %s1514_s4 = inlined_call_operand.vmem [shape: f32[128,2], index: 4, kind: input, shape index: {}]   ;;  %s1515_s5 = inlined_call_operand.vmem [shape: f32[1,2], index: 5, kind: input, shape index: {}]   ;;  %s1516_s6 = inlined_call_operand.vmem [shape: f32[40,2], index: 6, kind: output, shape index: {}]  }
   0x1   :  { %12 = vsyncpa [#allocation5], 0  ;;  %s1162_s21 = smov [#allocation2]   ;;  %s1114_s25 = scalar_lea.hbm %s1511_s1, 1152 }
   0x2   :  { %s20_s22 = sshll.u32 %s1162_s21, 4  ;;  %p1115_p0 = scmp.ne.s32.totalorder %s1511_s1, %s1114_s25  ;;  %s21_s22 = int_to_ptr.vmem [resolvable:$true] %s20_s22 }
   0x3   :  { %p1118_p1 = scmp.lt.u32.totalorder %s1114_s25, %s1511_s1 }
   0x5   :  { %p1120_p2 = pnand %p1118_p1, %p1115_p0 }
   0x7   :  { %1123 = shalt.err (!%p1120_p2)
}
   0x8   :  { %s1124_s30 = scalar_lea.vmem %s21_s22, 1152  ;;  %p1129_p4 = scmp.lt.s32.totalorder %s21_s22, %s21_s22 }
   0x9   :  { %p1125_p3 = scmp.ne.s32.totalorder %s21_s22, %s1124_s30  ;;  %p1130_p5 = scmp.lt.s32.totalorder %s1124_s30, %s1124_s30 }
   0xb   :  { %p1131_p6 = por %p1130_p5, %p1129_p4 }
   0xd   :  { %p1132_p7 = pnand %p1131_p6, %p1125_p3 }
   0xf   :  { %1135 = shalt.err (!%p1132_p7)
}
  0x10   :  { %s1163_s7 = smov 384   ;;  %s1164_s8 = smov 24  }
  0x11   :  { %26 = dma.hbm_to_vmem [thread:$0]  %s1511_s1, 1152, %s21_s22, [#allocation3], %s1163_s7, %s1163_s7, %s1164_s8  }
  0x12   :  { %s1165_s11 = smov [#allocation4]   ;;  %s1136_s15 = scalar_lea.hbm %s1513_s3, 2048 }
  0x13   :  { %s34_s12 = sshll.u32 %s1165_s11, 4  ;;  %p1137_p8 = scmp.ne.s32.totalorder %s1513_s3, %s1136_s15  ;;  %s35_s12 = int_to_ptr.vmem [resolvable:$true] %s34_s12 }
  0x14   :  { %p1140_p9 = scmp.lt.u32.totalorder %s1136_s15, %s1513_s3 }
  0x16   :  { %p1142_p10 = pnand %p1140_p9, %p1137_p8 }
  0x18   :  { %1145 = shalt.err (!%p1142_p10)
}
  0x19   :  { %s1146_s20 = scalar_lea.vmem %s35_s12, 2048  ;;  %p1151_p12 = scmp.lt.s32.totalorder %s35_s12, %s35_s12 }
  0x1a   :  { %p1147_p11 = scmp.ne.s32.totalorder %s35_s12, %s1146_s20  ;;  %p1152_p13 = scmp.lt.s32.totalorder %s1146_s20, %s1146_s20 }
  0x1c   :  { %p1153_p0 = por %p1152_p13, %p1151_p12 }
  0x1e   :  { %p1154_p1 = pnand %p1153_p0, %p1147_p11 }
  0x20   :  { %1157 = shalt.err (!%p1154_p1)
}
  0x21   :  { %s1166_s1 = smov 128   ;;  %s1167_s21 = smov 8  }
  0x22   :  { %40 = dma.hbm_to_vmem [thread:$0]  %s1513_s3, 2048, %s35_s12, [#allocation5], %s1166_s1, %s1166_s1, %s1167_s21  }
  0x23   :  { %1158 = dma.done.wait [#allocation3], 1152  }
  0x24   :  { %1159 = vsyncadd [#allocation3], 4294966144 }
  0x25   :  { %1160 = dma.done.wait [#allocation5], 2048  }
  0x26   :  { %1161 = vsyncadd [#allocation5], 4294965248  ;;  %v1168_v0 = vmov 1   ;;  %v1169_v1 = vmov 0   ;;  %v51_v2 = vld [vmem:[%s1510_s0] sm:$0xff]  ;;  %v52_v3 = vld [vmem:[%s1510_s0 + $0x8] sm:$0xff]  ;;  %v61_v32 = vlaneseq }
  0x27   :  { %1102 = vset.pattern.permute.xlu1 %v1168_v0  ;;  %1101 = vset.pattern.permute.xlu0 %v1169_v1  ;;  %v1079_v4 = vtrunc.f32 %v51_v2  ;;  %v151_v5 = vld [vmem:[#allocation2 + $0x8] sm:$0xff]  ;;  %v154_v6 = vld [vmem:[#allocation2 + $0x20] sm:$0xff]  ;;  %v1170_v7 = vmov 0.0|0.0   ;;  %v153_v9 = vld [vmem:[#allocation2 + $0x18] sm:$0xff]  ;;  %v1081_v10 = vtrunc.f32 %v52_v3  ;;  %v1171_v18 = vmov 2  }
  0x28   :  { %126 = vperm.xlu1 %1102, %v51_v2   ;;  %96 = vperm.xlu0 %1101, %v51_v2   ;;  %v150_v8 = vld [vmem:[#allocation2] sm:$0xff]  ;;  %v974_v12 = vpack.c.bf16 %v154_v6, %v151_v5  ;;  %v152_v13 = vld [vmem:[#allocation2 + $0x10] sm:$0xff]  ;;  %v155_v14 = vld [vmem:[#allocation2 + $0x28] sm:$0xff]  ;;  %vm175_vm0 = vcmask 1041408   ;;  %v1172_v22 = vmov 0.0   ;;  %vm1173_vm1 = vmmov 0  }
  0x29   :  { %978 = vmatprep.subr.bf16.mxu1 %v1170_v7  ;;  %v1080_v11 = vcvt.f32.s32 %v1079_v4  ;;  %v53_v15 = vld [vmem:[%s1510_s0 + $0x10] sm:$0xff]  ;;  %v976_v16 = vpack.c.bf16 %v153_v9, %v150_v8  ;;  %v979_v17 = vpack.c.bf16 %v155_v14, %v152_v13  ;;  %v1082_v19 = vcvt.f32.s32 %v1081_v10  ;;  %v157_v21 = vld [vmem:[#allocation2 + $0x38] sm:$0x3]  ;;  %v156_v23 = vld [vmem:[#allocation2 + $0x30] sm:$0x3]  ;;  %249 = vmatprep.mubr.f32.mxu0 %v1172_v22 }
  0x2a   :  { %v1083_v20 = vtrunc.f32 %v53_v15  ;;  %975 = vmatprep.subr.bf16.mxu0 %v974_v12  ;;  %v158_v24 = vld [vmem:[#allocation2 + $0x40] sm:$0x3]  ;;  %818 = vmatprep.mubr.msk.f32.mxu1 %vm1173_vm1, %v1172_v22  ;;  %v54_v26 = vld [vmem:[%s1510_s0 + $0x18] sm:$0xff]  ;;  %v55_v29 = vld [vmem:[%s1510_s0 + $0x20] sm:$0xff]  ;;  %v1260_v35 = vand.u32 127, %v61_v32  ;;  %vm159_vm5 = vcmask 146432  }
  0x2b   :  { %980 = vmatpush3.bf16.msra.mxu1 %v979_v17  ;;  %977 = vmatpush1.bf16.msra.mxu0 %v976_v16  ;;  %v1085_v27 = vtrunc.f32 %v54_v26  ;;  %v1087_v30 = vtrunc.f32 %v55_v29  ;;  %v375_v38 = vld [vmem:[%s1512_s2] sm:$0xff]  ;;  %v376_v39 = vld [vmem:[%s1512_s2 + $0x8] sm:$0xff]  ;;  %v377_v45 = vld [vmem:[%s1512_s2 + $0x10] sm:$0xff]  ;;  %vm710_vm10 = vcmask 15360  }
  0x2c   :  { %1103 = vset.pattern.permute.xlu1 %v1169_v1  ;;  %1104 = vset.pattern.permute.xlu0 %v1171_v18  ;;  %v1084_v25 = vcvt.f32.s32 %v1083_v20  ;;  %vm93_vm2 = vcmp.eq.s32.totalorder %v1260_v35, 16  ;;  %vm124_vm4 = vcmp.eq.s32.totalorder %v1260_v35, 17  ;;  %v982_v42 = vpack.c.bf16 %v376_v39, %v375_v38  ;;  %v378_v46 = vld [vmem:[%s1512_s2 + $0x18] sm:$0xff]  ;;  %v379_v53 = vld [vmem:[%s1512_s2 + $0x20] sm:$0xff]  ;;  %v380_v54 = vld [vmem:[%s1512_s2 + $0x28] sm:$0xff] }
  0x2d   :  { %101 = vperm.xlu1 %1103, %v52_v3   ;;  %64 = vperm.xlu0 %1104, %v1080_v11   ;;  %v1086_v28 = vcvt.f32.s32 %v1085_v27  ;;  %v1088_v31 = vcvt.f32.s32 %v1087_v30  ;;  %v985_v50 = vpack.c.bf16 %v378_v46, %v377_v45  ;;  %v988_v55 = vpack.c.bf16 %v380_v54, %v379_v53  ;;  %v381_v57 = vld [vmem:[%s1512_s2 + $0x30] sm:$0xff]  ;;  %v382_v58 = vld [vmem:[%s1512_s2 + $0x38] sm:$0xff]  ;;  %v387_v13 = vld [vmem:[%s1512_s2 + $0x60] sm:$0xff] }
  0x2e   :  { %816 = vmatprep.subr.mxu1 %v1172_v22  ;;  %727 = vmatprep.subr.msk.mxu0 %vm175_vm0, %v157_v21  ;;  %v991_v63 = vpack.c.bf16 %v382_v58, %v381_v57  ;;  %v385_v6 = vld [vmem:[%s1512_s2 + $0x50] sm:$0xff]  ;;  %v386_v8 = vld [vmem:[%s1512_s2 + $0x58] sm:$0xff]  ;;  %v388_v14 = vld [vmem:[%s1512_s2 + $0x68] sm:$0xff] }
  0x2f   :  { %728 = vmatpush1.msk.msra.mxu0 %vm175_vm0, %v156_v23  ;;  %817 = vmatpush3.msk.msra.mxu1 %vm175_vm0, %v158_v24  ;;  %v997_v11 = vpack.c.bf16 %v386_v8, %v385_v6  ;;  %v389_v23 = vld [vmem:[%s1512_s2 + $0x70] sm:$0xff]  ;;  %v390_v24 = vld [vmem:[%s1512_s2 + $0x78] sm:$0xff]  ;;  %v489_v30 = vld [vmem:[#allocation4 + $0x18] sm:$0xff] }
  0x30   :  { %981 = vmatprep.subr.bf16.mxu0 %v1170_v7  ;;  %1005 = vmatprep.subr.bf16.mxu1 %v1170_v7  ;;  %v487_v27 = vld [vmem:[#allocation4 + $0x8] sm:$0xff]  ;;  %v490_v32 = vld [vmem:[#allocation4 + $0x20] sm:$0xff]  ;;  %v601_v8 = vld [vmem:[%s1514_s4 + $0x20] sm:$0xff] }
  0x31   :  { %1106 = vset.pattern.permute.xlu1 %v1171_v18  ;;  %1105 = vset.pattern.permute.xlu0 %v1168_v0  ;;  %v494_v38 = vld [vmem:[#allocation4 + $0x40] sm:$0xff]  ;;  %v495_v39 = vld [vmem:[#allocation4 + $0x48] sm:$0xff] }
  0x32   :  { %67 = vperm.xlu1 %1106, %v1082_v19   ;;  %130 = vperm.xlu0 %1105, %v52_v3   ;;  %v499_v45 = vld [vmem:[#allocation4 + $0x68] sm:$0xff] }
  0x36   :  { %70 = vperm.xlu1 %1106, %v1084_v25   ;;  %134 = vperm.xlu0 %1105, %v53_v15   ;;  %v1003_v25 = vpack.c.bf16 %v390_v24, %v389_v23 }
  0x3a   :  { %1107 = vset.pattern.permute.xlu1 %v1169_v1  ;;  %1109 = vset.pattern.permute.xlu0 %v1169_v1  ;;  %v384_v1 = vld [vmem:[%s1512_s2 + $0x48] sm:$0xff] }
  0x3b   :  { %106 = vperm.xlu1 %1107, %v53_v15   ;;  %111 = vperm.xlu0 %1109, %v54_v26   ;;  %v1000_v15 = vpack.c.bf16 %v388_v14, %v387_v13  ;;  %v605_v14 = vld [vmem:[%s1514_s4 + $0x40] sm:$0xff] }
  0x3f   :  { %1108 = vset.pattern.permute.xlu1 %v1171_v18  ;;  %116 = vperm.xlu0 %1109, %v55_v29  }
  0x40   :  { %73 = vperm.xlu1 %1108, %v1086_v28   ;;  %v488_v28 = vld [vmem:[#allocation4 + $0x10] sm:$0xff] }
  0x43   :  { %1113 = vset.pattern.permute.xlu0 %v1168_v0 }
  0x44   :  { %1110 = vset.pattern.permute.xlu1 %v1168_v0 }
  0x45   :  { %138 = vperm.xlu1 %1110, %v54_v26   ;;  %v486_v26 = vld [vmem:[#allocation4] sm:$0xff] }
  0x49   :  { %1111 = vset.pattern.permute.xlu1 %v1171_v18 }
  0x4a   :  { %76 = vperm.xlu1 %1111, %v1088_v31   ;;  %v1009_v31 = vpack.c.bf16 %v489_v30, %v488_v28 }
  0x4e   :  { %1112 = vset.pattern.permute.xlu1 %v1168_v0  ;;  %v383_v0 = vld [vmem:[%s1512_s2 + $0x40] sm:$0xff] }
  0x4f   :  { %142 = vperm.xlu1 %1112, %v55_v29   ;;  %v994_v3 = vpack.c.bf16 %v384_v1, %v383_v0  ;;  %v1006_v29 = vpack.c.bf16 %v487_v27, %v486_v26  ;;  %v597_v1 = vld [vmem:[%s1514_s4] sm:$0xff] }
  0xa7   :  { %v127_v33 = vpop.permute.xlu1 %126  ;;  %v97_v34 = vpop.permute.xlu0 %96 }
  0xac   :  { %v102_v36 = vpop.permute.xlu1 %101  ;;  %v65_v37 = vpop.permute.xlu0 %64 }
  0xad   :  { %vm78_vm3 = vcmp.eq.s32.totalorder %v1260_v35, %v65_v37 }
  0xae   :  { %v722_v40 = vsel %vm78_vm3, 1.0, %v1172_v22 }
  0xaf   :  { %v119_v41 = vsel %vm93_vm2, %v97_v34, %v722_v40  ;;  %v1018_v40 = vpack.c.bf16 %v495_v39, %v494_v38 }
  0xb0   :  { %v145_v43 = vsel %vm124_vm4, %v127_v33, %v119_v41  ;;  %v491_v33 = vld [vmem:[#allocation4 + $0x28] sm:$0xff]  ;;  %v496_v41 = vld [vmem:[#allocation4 + $0x50] sm:$0xff] }
  0xb1   :  { %v68_v44 = vpop.permute.xlu1 %67  ;;  %729 = vmatmul.mubr.msk.f32.vlgmr.msra.gmra.mrb[0].mxu0 %vm159_vm5, %v145_v43  ;;  %819 = vmatmul.mubr.msk.f32.vlgmr.msra.gmra.mrb[0].mxu1 %vm159_vm5, %v145_v43  ;;  %v131_v47 = vpop.permute.xlu0 %130  ;;  %v1012_v34 = vpack.c.bf16 %v491_v33, %v490_v32 }
  0xb2   :  { %vm79_vm6 = vcmp.eq.s32.totalorder %v1260_v35, %v68_v44  ;;  %255 = vmatprep.mubr.f32.mxu0 %v1172_v22  ;;  %821 = vmatprep.mubr.msk.f32.mxu1 %vm1173_vm1, %v1172_v22  ;;  %v498_v44 = vld [vmem:[#allocation4 + $0x60] sm:$0xff] }
  0xb3   :  { %v723_v48 = vsel %vm79_vm6, 1.0, %v1172_v22  ;;  %983 = vmatpush3.bf16.msra.mxu0 %v982_v42  ;;  %1007 = vmatpush3.bf16.msra.mxu1 %v1006_v29  ;;  %v497_v42 = vld [vmem:[#allocation4 + $0x58] sm:$0xff]  ;;  %v1024_v46 = vpack.c.bf16 %v499_v45, %v498_v44  ;;  %v611_v44 = vld [vmem:[%s1514_s4 + $0x70] sm:$0xff]  ;;  %v612_v45 = vld [vmem:[%s1514_s4 + $0x78] sm:$0xff] }
  0xb4   :  { %v120_v49 = vsel %vm93_vm2, %v102_v36, %v723_v48  ;;  %984 = vmatprep.subr.bf16.mxu0 %v1170_v7  ;;  %1008 = vmatprep.subr.bf16.mxu1 %v1170_v7  ;;  %v493_v36 = vld [vmem:[#allocation4 + $0x38] sm:$0xff]  ;;  %v1021_v43 = vpack.c.bf16 %v497_v42, %v496_v41 }
  0xb5   :  { %v146_v51 = vsel %vm124_vm4, %v131_v47, %v120_v49  ;;  %v71_v52 = vpop.permute.xlu1 %70  ;;  %v135_v56 = vpop.permute.xlu0 %134 }
  0xb6   :  { %730 = vmatmul.mubr.msk.f32.gmra.mrb[2].mxu0 %vm159_vm5, %v146_v51  ;;  %822 = vmatmul.mubr.msk.f32.gmra.mrb[2].mxu1 %vm159_vm5, %v146_v51  ;;  %vm80_vm7 = vcmp.eq.s32.totalorder %v1260_v35, %v71_v52 }
  0xb7   :  { %261 = vmatprep.mubr.f32.mxu0 %v1172_v22  ;;  %824 = vmatprep.mubr.msk.f32.mxu1 %vm1173_vm1, %v1172_v22  ;;  %v724_v59 = vsel %vm80_vm7, 1.0, %v1172_v22 }
  0xb8   :  { %986 = vmatpush3.bf16.msra.mxu0 %v985_v50  ;;  %1010 = vmatpush3.bf16.msra.mxu1 %v1009_v31 }
  0xb9   :  { %987 = vmatprep.subr.bf16.mxu0 %v1170_v7  ;;  %1011 = vmatprep.subr.bf16.mxu1 %v1170_v7 }
  0xba   :  { %v107_v60 = vpop.permute.xlu1 %106  ;;  %v112_v5 = vpop.permute.xlu0 %111 }
  0xbb   :  { %v121_v61 = vsel %vm93_vm2, %v107_v60, %v724_v59 }
  0xbc   :  { %v147_v62 = vsel %vm124_vm4, %v135_v56, %v121_v61  ;;  %989 = vmatpush3.bf16.msra.mxu0 %v988_v55  ;;  %1013 = vmatpush3.bf16.msra.mxu1 %v1012_v34 }
  0xbd   :  { %731 = vmatmul.mubr.msk.f32.gmra.mrb[4].mxu0 %vm159_vm5, %v147_v62  ;;  %825 = vmatmul.mubr.msk.f32.gmra.mrb[4].mxu1 %vm159_vm5, %v147_v62  ;;  %v500_v62 = vld [vmem:[#allocation4 + $0x70] sm:$0xff] }
  0xbe   :  { %267 = vmatprep.mubr.f32.mxu0 %v1172_v22  ;;  %827 = vmatprep.mubr.msk.f32.mxu1 %vm1173_vm1, %v1172_v22  ;;  %v117_v18 = vpop.permute.xlu0 %116 }
  0xbf   :  { %v74_v2 = vpop.permute.xlu1 %73  ;;  %990 = vmatprep.subr.bf16.mxu0 %v1170_v7  ;;  %1014 = vmatprep.subr.bf16.mxu1 %v1170_v7 }
  0xc0   :  { %vm81_vm8 = vcmp.eq.s32.totalorder %v1260_v35, %v74_v2  ;;  %992 = vmatpush3.bf16.msra.mxu0 %v991_v63  ;;  %v501_v63 = vld [vmem:[#allocation4 + $0x78] sm:$0xff] }
  0xc1   :  { %v725_v4 = vsel %vm81_vm8, 1.0, %v1172_v22  ;;  %993 = vmatprep.subr.bf16.mxu0 %v1170_v7  ;;  %v1027_v0 = vpack.c.bf16 %v501_v63, %v500_v62  ;;  %v598_v2 = vld [vmem:[%s1514_s4 + $0x8] sm:$0xff] }
  0xc2   :  { %v122_v9 = vsel %vm93_vm2, %v112_v5, %v725_v4  ;;  %v1030_v4 = vpack.c.bf16 %v598_v2, %v597_v1  ;;  %v600_v5 = vld [vmem:[%s1514_s4 + $0x18] sm:$0xff] }
  0xc4   :  { %v139_v10 = vpop.permute.xlu1 %138  ;;  %995 = vmatpush3.bf16.msra.mxu0 %v994_v3  ;;  %v599_v3 = vld [vmem:[%s1514_s4 + $0x10] sm:$0xff] }
  0xc5   :  { %v148_v12 = vsel %vm124_vm4, %v139_v10, %v122_v9  ;;  %996 = vmatprep.subr.bf16.mxu0 %v1170_v7  ;;  %v1033_v6 = vpack.c.bf16 %v600_v5, %v599_v3  ;;  %v602_v9 = vld [vmem:[%s1514_s4 + $0x28] sm:$0xff] }
  0xc6   :  { %732 = vmatmul.mubr.msk.f32.gmra.mrb[6].mxu0 %vm159_vm5, %v148_v12  ;;  %828 = vmatmul.mubr.msk.f32.gmra.mrb[6].mxu1 %vm159_vm5, %v148_v12  ;;  %v1036_v10 = vpack.c.bf16 %v602_v9, %v601_v8  ;;  %v604_v12 = vld [vmem:[%s1514_s4 + $0x38] sm:$0xff] }
  0xc7   :  { %273 = vmatprep.mubr.f32.mxu0 %v1172_v22  ;;  %830 = vmatprep.mubr.msk.f32.mxu1 %vm1173_vm1, %v1172_v22 }
  0xc8   :  { %998 = vmatpush3.bf16.msra.mxu0 %v997_v11  ;;  %v603_v11 = vld [vmem:[%s1514_s4 + $0x30] sm:$0xff] }
  0xc9   :  { %v77_v16 = vpop.permute.xlu1 %76  ;;  %999 = vmatprep.subr.bf16.mxu0 %v1170_v7  ;;  %v1039_v13 = vpack.c.bf16 %v604_v12, %v603_v11 }
  0xca   :  { %vm82_vm9 = vcmp.eq.s32.totalorder %v1260_v35, %v77_v16  ;;  %v492_v35 = vld [vmem:[#allocation4 + $0x30] sm:$0xff] }
  0xcb   :  { %v726_v17 = vsel %vm82_vm9, 1.0, %v1172_v22  ;;  %v1015_v37 = vpack.c.bf16 %v493_v36, %v492_v35 }
  0xcc   :  { %1001 = vmatpush3.bf16.msra.mxu0 %v1000_v15  ;;  %v123_v19 = vsel %vm93_vm2, %v117_v18, %v726_v17  ;;  %v606_v15 = vld [vmem:[%s1514_s4 + $0x48] sm:$0xff]  ;;  %v607_v17 = vld [vmem:[%s1514_s4 + $0x50] sm:$0xff]  ;;  %v608_v18 = vld [vmem:[%s1514_s4 + $0x58] sm:$0xff] }
  0xcd   :  { %1002 = vmatprep.subr.bf16.mxu0 %v1170_v7  ;;  %1016 = vmatpush3.bf16.msra.mxu1 %v1015_v37  ;;  %v1042_v16 = vpack.c.bf16 %v606_v15, %v605_v14 }
  0xce   :  { %v143_v20 = vpop.permute.xlu1 %142  ;;  %1017 = vmatprep.subr.bf16.mxu1 %v1170_v7 }
  0xcf   :  { %v149_v21 = vsel %vm124_vm4, %v143_v20, %v123_v19  ;;  %v1045_v19 = vpack.c.bf16 %v608_v18, %v607_v17  ;;  %v609_v20 = vld [vmem:[%s1514_s4 + $0x60] sm:$0xff] }
  0xd0   :  { %733 = vmatmul.mubr.msk.f32.gmra.mrb[8].mxu0 %vm159_vm5, %v149_v21  ;;  %831 = vmatmul.mubr.msk.f32.gmra.mrb[8].mxu1 %vm159_vm5, %v149_v21  ;;  %v610_v21 = vld [vmem:[%s1514_s4 + $0x68] sm:$0xff] }
  0xd1   :  { %865 = vmatprep.mubr.msk.f32.mxu0 %vm1173_vm1, %v1172_v22  ;;  %912 = vmatprep.mubr.msk.f32.mxu1 %vm1173_vm1, %v1172_v22  ;;  %v1048_v23 = vpack.c.bf16 %v610_v21, %v609_v20 }
  0xd2   :  { %1004 = vmatpush3.bf16.msra.mxu0 %v1003_v25  ;;  %1019 = vmatpush3.bf16.msra.mxu1 %v1018_v40 }
  0xd3   :  { %1029 = vmatprep.subr.bf16.mxu0 %v1170_v7  ;;  %1020 = vmatprep.subr.bf16.mxu1 %v1170_v7 }
  0xd6   :  { %1022 = vmatpush3.bf16.msra.mxu1 %v1021_v43 }
  0xd7   :  { %1023 = vmatprep.subr.bf16.mxu1 %v1170_v7 }
  0xda   :  { %1025 = vmatpush3.bf16.msra.mxu1 %v1024_v46  ;;  %v1051_v46 = vpack.c.bf16 %v612_v45, %v611_v44 }
  0xdb   :  { %1026 = vmatprep.subr.bf16.mxu1 %v1170_v7 }
  0xde   :  { %1028 = vmatpush3.bf16.msra.mxu1 %v1027_v0 }
  0xdf   :  { %1053 = vmatprep.subr.bf16.mxu1 %v1170_v7 }
 0x184   :  { %v251_v47 = vpop.f32.mrb[0].mxu0 }
 0x185   :  { %v370_v48 = vmax.f32 %v251_v47, 0.0  ;;  %v1383_v49 = vpop.f32.mrb[1].mxu0 }
 0x187   :  { %866 = vmatmul.mubr.f32.vlgmr.msra.gmra.mrb[10].mxu0 %v370_v48 }
 0x188   :  { %868 = vmatprep.mubr.msk.f32.mxu0 %vm1173_vm1, %v1172_v22  ;;  %1031 = vmatpush3.bf16.msra.mxu0 %v1030_v4 }
 0x189   :  { %v257_v50 = vpop.f32.mrb[2].mxu0  ;;  %1032 = vmatprep.subr.bf16.mxu0 %v1170_v7 }
 0x18a   :  { %v371_v51 = vmax.f32 %v257_v50, 0.0  ;;  %v1387_v52 = vpop.f32.mrb[3].mxu0 }
 0x18c   :  { %869 = vmatmul.mubr.f32.gmra.mrb[12].mxu0 %v371_v51 }
 0x18d   :  { %871 = vmatprep.mubr.msk.f32.mxu0 %vm1173_vm1, %v1172_v22  ;;  %1034 = vmatpush3.bf16.msra.mxu0 %v1033_v6 }
 0x18e   :  { %1035 = vmatprep.subr.bf16.mxu0 %v1170_v7 }
 0x190   :  { %v263_v53 = vpop.f32.mrb[4].mxu0 }
 0x191   :  { %v372_v54 = vmax.f32 %v263_v53, 0.0  ;;  %v1391_v55 = vpop.f32.mrb[5].mxu0  ;;  %1037 = vmatpush3.bf16.msra.mxu0 %v1036_v10 }
 0x192   :  { %1038 = vmatprep.subr.bf16.mxu0 %v1170_v7 }
 0x193   :  { %872 = vmatmul.mubr.f32.gmra.mrb[14].mxu0 %v372_v54 }
 0x194   :  { %874 = vmatprep.mubr.msk.f32.mxu0 %vm1173_vm1, %v1172_v22 }
 0x195   :  { %1040 = vmatpush3.bf16.msra.mxu0 %v1039_v13 }
 0x196   :  { %1041 = vmatprep.subr.bf16.mxu0 %v1170_v7 }
 0x199   :  { %v269_v56 = vpop.f32.mrb[6].mxu0  ;;  %1043 = vmatpush3.bf16.msra.mxu0 %v1042_v16 }
 0x19a   :  { %v373_v57 = vmax.f32 %v269_v56, 0.0  ;;  %v1395_v58 = vpop.f32.mrb[7].mxu0  ;;  %1044 = vmatprep.subr.bf16.mxu0 %v1170_v7 }
 0x19c   :  { %875 = vmatmul.mubr.f32.gmra.mrb[16].mxu0 %v373_v57 }
 0x19d   :  { %877 = vmatprep.mubr.msk.f32.mxu0 %vm1173_vm1, %v1172_v22  ;;  %1046 = vmatpush3.bf16.msra.mxu0 %v1045_v19 }
 0x19e   :  { %1047 = vmatprep.subr.bf16.mxu0 %v1170_v7 }
 0x1a1   :  { %1049 = vmatpush3.bf16.msra.mxu0 %v1048_v23 }
 0x1a2   :  { %1050 = vmatprep.subr.bf16.mxu0 %v1170_v7 }
 0x1a3   :  { %v275_v59 = vpop.f32.mrb[8].mxu0 }
 0x1a4   :  { %v374_v60 = vmax.f32 %v275_v59, 0.0  ;;  %v1399_v61 = vpop.f32.mrb[9].mxu0 }
 0x1a5   :  { %1052 = vmatpush3.bf16.msra.mxu0 %v1051_v46 }
 0x1a6   :  { %878 = vmatmul.mubr.f32.gmra.mrb[18].mxu0 %v374_v60 }
 0x1a7   :  { %959 = vmatprep.mubr.msk.f32.mxu0 %vm1173_vm1, %v1172_v22 }
 0x25a   :  { %v457_v24 = vpop.f32.mrb[10].mxu0 }
 0x25b   :  { %v458_v25 = vadd.f32 %v457_v24, %v1383_v49  ;;  %v867_v26 = vpop.f32.mrb[11].mxu0 }
 0x25d   :  { %v481_v27 = vmax.f32 %v458_v25, 0.0 }
 0x25f   :  { %v462_v28 = vpop.f32.mrb[12].mxu0  ;;  %913 = vmatmul.mubr.f32.vlgmr.msra.gmra.mrb[0].mxu1 %v481_v27 }
 0x260   :  { %v463_v29 = vadd.f32 %v462_v28, %v1387_v52  ;;  %v870_v30 = vpop.f32.mrb[13].mxu0  ;;  %915 = vmatprep.mubr.msk.f32.mxu1 %vm1173_vm1, %v1172_v22  ;;  %1061 = vmatpush3.bf16.msra.mxu1 %v1030_v4 }
 0x261   :  { %1054 = vmatprep.subr.bf16.mxu1 %v1170_v7 }
 0x262   :  { %v482_v31 = vmax.f32 %v463_v29, 0.0 }
 0x264   :  { %916 = vmatmul.mubr.f32.gmra.mrb[2].mxu1 %v482_v31 }
 0x265   :  { %918 = vmatprep.mubr.msk.f32.mxu1 %vm1173_vm1, %v1172_v22  ;;  %1062 = vmatpush3.bf16.msra.mxu1 %v1033_v6 }
 0x266   :  { %v467_v32 = vpop.f32.mrb[14].mxu0  ;;  %1055 = vmatprep.subr.bf16.mxu1 %v1170_v7 }
 0x267   :  { %v468_v33 = vadd.f32 %v467_v32, %v1391_v55  ;;  %v873_v34 = vpop.f32.mrb[15].mxu0 }
 0x269   :  { %v483_v35 = vmax.f32 %v468_v33, 0.0  ;;  %1063 = vmatpush3.bf16.msra.mxu1 %v1036_v10 }
 0x26a   :  { %1056 = vmatprep.subr.bf16.mxu1 %v1170_v7 }
 0x26b   :  { %919 = vmatmul.mubr.f32.gmra.mrb[4].mxu1 %v483_v35 }
 0x26c   :  { %921 = vmatprep.mubr.msk.f32.mxu1 %vm1173_vm1, %v1172_v22 }
 0x26d   :  { %1064 = vmatpush3.bf16.msra.mxu1 %v1039_v13 }
 0x26e   :  { %1057 = vmatprep.subr.bf16.mxu1 %v1170_v7 }
 0x26f   :  { %v472_v36 = vpop.f32.mrb[16].mxu0 }
 0x270   :  { %v473_v37 = vadd.f32 %v472_v36, %v1395_v58  ;;  %v876_v38 = vpop.f32.mrb[17].mxu0 }
 0x271   :  { %1065 = vmatpush3.bf16.msra.mxu1 %v1042_v16 }
 0x272   :  { %v484_v39 = vmax.f32 %v473_v37, 0.0  ;;  %1058 = vmatprep.subr.bf16.mxu1 %v1170_v7 }
 0x274   :  { %922 = vmatmul.mubr.f32.gmra.mrb[6].mxu1 %v484_v39 }
 0x275   :  { %924 = vmatprep.mubr.msk.f32.mxu1 %vm1173_vm1, %v1172_v22  ;;  %1066 = vmatpush3.bf16.msra.mxu1 %v1045_v19 }
 0x276   :  { %1059 = vmatprep.subr.bf16.mxu1 %v1170_v7 }
 0x279   :  { %v477_v40 = vpop.f32.mrb[18].mxu0  ;;  %1067 = vmatpush3.bf16.msra.mxu1 %v1048_v23 }
 0x27a   :  { %v478_v41 = vadd.f32 %v477_v40, %v1399_v61  ;;  %v879_v42 = vpop.f32.mrb[19].mxu0  ;;  %1060 = vmatprep.subr.bf16.mxu1 %v1170_v7  ;;  %v740_v61 = vld [vmem:[%s1515_s5] ss:$0 sm:$0xff] }
 0x27c   :  { %v485_v43 = vmax.f32 %v478_v41, 0.0 }
 0x27d   :  { %1068 = vmatpush3.bf16.msra.mxu1 %v1051_v46 }
 0x27e   :  { %925 = vmatmul.mubr.f32.gmra.mrb[8].mxu1 %v485_v43 }
 0x27f   :  { %968 = vmatprep.mubr.msk.f32.mxu1 %vm1173_vm1, %v1172_v22 }
 0x332   :  { %v568_v47 = vpop.f32.mrb[0].mxu1 }
 0x333   :  { %v592_v48 = vmax.f32 %v568_v47, 0.0  ;;  %v914_v49 = vpop.f32.mrb[1].mxu1 }
 0x335   :  { %960 = vmatmul.mubr.f32.vlgmr.msra.gmra.mrb[20].mxu0 %v592_v48 }
 0x336   :  { %962 = vmatprep.mubr.msk.f32.mxu0 %vm1173_vm1, %v1172_v22 }
 0x337   :  { %v573_v7 = vpop.f32.mrb[2].mxu1 }
 0x338   :  { %v593_v50 = vmax.f32 %v573_v7, 0.0  ;;  %v917_v51 = vpop.f32.mrb[3].mxu1 }
 0x33a   :  { %963 = vmatmul.mubr.f32.gmra.mrb[22].mxu0 %v593_v50 }
 0x33b   :  { %965 = vmatprep.mubr.msk.f32.mxu0 %vm1173_vm1, %v1172_v22 }
 0x33e   :  { %v578_v52 = vpop.f32.mrb[4].mxu1 }
 0x33f   :  { %v594_v53 = vmax.f32 %v578_v52, 0.0  ;;  %v920_v54 = vpop.f32.mrb[5].mxu1 }
 0x341   :  { %966 = vmatmul.mubr.f32.gmra.mrb[24].mxu0 %v594_v53 }
 0x347   :  { %v583_v55 = vpop.f32.mrb[6].mxu1 }
 0x348   :  { %v595_v56 = vmax.f32 %v583_v55, 0.0  ;;  %v923_v57 = vpop.f32.mrb[7].mxu1 }
 0x34a   :  { %969 = vmatmul.mubr.f32.vlgmr.msra.gmra.mrb[10].mxu1 %v595_v56 }
 0x34b   :  { %971 = vmatprep.mubr.msk.f32.mxu1 %vm1173_vm1, %v1172_v22 }
 0x351   :  { %v588_v58 = vpop.f32.mrb[8].mxu1 }
 0x352   :  { %v596_v59 = vmax.f32 %v588_v58, 0.0  ;;  %v926_v60 = vpop.f32.mrb[9].mxu1 }
 0x354   :  { %972 = vmatmul.mubr.f32.gmra.mrb[12].mxu1 %v596_v59 }
 0x408   :  { %v686_v62 = vpop.f32.mrb[20].mxu0 }
 0x409   :  { %v687_v63 = vadd.f32 %v740_v61, %v686_v62  ;;  %v961_v0 = vpop.f32.mrb[21].mxu0 }
 0x40b   :  { %711 = vst.msk [vmem:[%s1516_s6] sm:$0xff] %vm710_vm10, %v687_v63 }
 0x40d   :  { %v691_v1 = vpop.f32.mrb[22].mxu0 }
 0x40e   :  { %v692_v2 = vadd.f32 %v740_v61, %v691_v1  ;;  %v964_v22 = vpop.f32.mrb[23].mxu0 }
 0x410   :  { %712 = vst.msk [vmem:[%s1516_s6 + $0x8] sm:$0xff] %vm710_vm10, %v692_v2 }
 0x414   :  { %v696_v3 = vpop.f32.mrb[24].mxu0 }
 0x415   :  { %v697_v4 = vadd.f32 %v740_v61, %v696_v3  ;;  %v967_v5 = vpop.f32.mrb[25].mxu0 }
 0x417   :  { %713 = vst.msk [vmem:[%s1516_s6 + $0x10] sm:$0xff] %vm710_vm10, %v697_v4 }
 0x41d   :  { %v701_v6 = vpop.f32.mrb[10].mxu1 }
 0x41e   :  { %v702_v8 = vadd.f32 %v740_v61, %v701_v6  ;;  %v970_v9 = vpop.f32.mrb[11].mxu1 }
 0x420   :  { %714 = vst.msk [vmem:[%s1516_s6 + $0x18] sm:$0xff] %vm710_vm10, %v702_v8 }
 0x427   :  { %v706_v10 = vpop.f32.mrb[12].mxu1 }
 0x428   :  { %v707_v11 = vadd.f32 %v740_v61, %v706_v10  ;;  %v973_v12 = vpop.f32.mrb[13].mxu1 }
 0x42a   :  { %715 = vst.msk [vmem:[%s1516_s6 + $0x20] sm:$0xff] %vm710_vm10, %v707_v11 }
 0x42b   :  { %720 = vsyncpa [#allocation3], 1 }
 0x42c   :  { %721 = vsyncpa [#allocation5], 1 }

</bundles_post_ra>
